<compile_context>
chip_gen: v7x
topology: tpu7x:2x2x1
jax: 0.10.0
libtpu: 0.0.40
codegen_flags: <defaults>
</compile_context>

<pallas_src>
import numpy as np
import jax
import jax.numpy as jnp
from jax.experimental import pallas as pl
from jax.experimental.pallas import tpu as pltpu


def _upsample_matrix_np(in_size: int, out_size: int,
                        align_corners: bool = False) -> np.ndarray:
    """Dense [out_size, in_size] matrix reproducing PyTorch 1-D bilinear
    interpolation (host-side numpy constant)."""
    o = np.arange(out_size, dtype=np.float64)
    if align_corners:
        scale = (in_size - 1) / (out_size - 1) if out_size > 1 else 0.0
        src = o * scale
    else:
        src = (o + 0.5) * (in_size / out_size) - 0.5
    src = np.clip(src, 0.0, in_size - 1)          # clamp both edges
    i0 = np.minimum(np.floor(src).astype(np.int64), in_size - 1)
    i1 = np.minimum(i0 + 1, in_size - 1)
    w1 = (src - i0).astype(np.float32)
    w0 = (1.0 - w1).astype(np.float32)
    m = np.zeros((out_size, in_size), np.float32)
    rows = np.arange(out_size)
    m[rows, i0] += w0
    m[rows, i1] += w1
    return m


def _skip_upsample_kernel(x_ref, wwT_ref, a_ref, y_ref, o_ref):
    # x_ref:   [1, Cin*H, W]       one batch element, W on lanes
    # wwT_ref: [W, T_OW]           W-axis upsample weights (output-column tile)
    # a_ref:   [Cout*OH, Cin*H]    kron(Wc, Wh): 1x1 conv fused into H-axis pass
    # y_ref:   [1, Cout*OH, T_OW]  skip tensor tile
    # o_ref:   [1, Cout*OH, T_OW]
    xw = jnp.dot(x_ref[0], wwT_ref[...],
                 preferred_element_type=jnp.float32)       # [Cin*H, T_OW]
    up = jnp.dot(a_ref[...], xw,
                 preferred_element_type=jnp.float32)       # [Cout*OH, T_OW]
    o_ref[0] = (up + y_ref[0]).astype(o_ref.dtype)


def _pick_ow_tile(ow: int) -> int:
    for t in (512, 256, 128):
        if ow % t == 0:
            return t
    return ow


def skip_upsample(x_nchw, y_nchw, conv_weight):
    """x_nchw: [N, Cin, H, W], y_nchw: [N, Cout, 2H, 2W],
    conv_weight: [Cout, Cin, 1, 1] (PyTorch Conv2d layout, bias-free)."""
    N, Cin, H, W = x_nchw.shape
    Ny, Cout, OH, OW = y_nchw.shape
    assert Ny == N and OH == 2 * H and OW == 2 * W

    # Free row-major reshapes — channels-first preserved, no transposes.
    x2 = x_nchw.reshape(N, Cin * H, W)
    y2 = y_nchw.reshape(N, Cout * OH, OW)

    # Static 1-D upsample matrices (host numpy constants).
    wh = jnp.asarray(_upsample_matrix_np(H, OH))            # [OH, H]
    wwT = jnp.asarray(_upsample_matrix_np(W, OW).T)         # [W, OW]

    # Fuse the bias-free 1x1 conv into the H-axis pass (they commute with the
    # per-channel upsample):  A[(co,oh), (ci,h)] = Wc[co,ci] * Wh[oh,h].
    wc = conv_weight[:, :, 0, 0].astype(jnp.float32)         # [Cout, Cin]
    a = jnp.kron(wc, wh)                                     # [Cout*OH, Cin*H]

    t_ow = _pick_ow_tile(OW)
    grid = (N, OW // t_ow)

    out2 = pl.pallas_call(
        _skip_upsample_kernel,
        out_shape=jax.ShapeDtypeStruct((N, Cout * OH, OW), x_nchw.dtype),
        grid=grid,
        in_specs=[
            pl.BlockSpec((1, Cin * H, W), lambda n, j: (n, 0, 0)),
            pl.BlockSpec((W, t_ow), lambda n, j: (0, j)),
            pl.BlockSpec((Cout * OH, Cin * H), lambda n, j: (0, 0)),
            pl.BlockSpec((1, Cout * OH, t_ow), lambda n, j: (n, 0, j)),
        ],
        out_specs=pl.BlockSpec((1, Cout * OH, t_ow), lambda n, j: (n, 0, j)),
        compiler_params=pltpu.CompilerParams(
            dimension_semantics=("parallel", "parallel")),
    )(x2, wwT, a, y2)

    return out2.reshape(N, Cout, OH, OW)                     # free reshape, NCHW


def _bilinear_x2_ref(x_nchw):
    """Independent gather-based PyTorch-style bilinear x2 (align_corners=False)."""
    _, _, H, W = x_nchw.shape
    OH, OW = 2 * H, 2 * W

    def coords(n_in, n_out):
        o = jnp.arange(n_out, dtype=jnp.float32)
        src = jnp.clip((o + 0.5) * (n_in / n_out) - 0.5, 0.0, n_in - 1)
        i0 = jnp.floor(src).astype(jnp.int32)
        i1 = jnp.minimum(i0 + 1, n_in - 1)
        t = src - i0.astype(jnp.float32)
        return i0, i1, t

    h0, h1, th = coords(H, OH)
    w0, w1, tw = coords(W, OW)
    rows = (x_nchw[:, :, h0, :] * (1.0 - th)[None, None, :, None]
            + x_nchw[:, :, h1, :] * th[None, None, :, None])
    return (rows[:, :, :, w0] * (1.0 - tw)[None, None, None, :]
            + rows[:, :, :, w1] * tw[None, None, None, :])


if __name__ == "__main__":
    # Module config: SkipUpSample(in_channels=4, s_factor=4)
    N = 2
    in_channels = 4
    s_factor = 4
    Cin = in_channels + s_factor      # 8
    Cout = in_channels                # 4
    H = W = 16

    key = jax.random.PRNGKey(0)
    kx, ky, kw = jax.random.split(key, 3)
    x = jax.random.normal(kx, (N, Cin, H, W), jnp.float32)                # NCHW
    y = jax.random.normal(ky, (N, Cout, 2 * H, 2 * W), jnp.float32)       # NCHW
    conv_weight = (jax.random.normal(kw, (Cout, Cin, 1, 1), jnp.float32)
                   * (1.0 / np.sqrt(Cin)))

    out = skip_upsample(x, y, conv_weight)
    jax.block_until_ready(out)

    # Pure-JAX reference implemented independently of the kernel's path:
    # gather-based bilinear upsample, conv AFTER upsample, channels-first.
    up = _bilinear_x2_ref(x)                                              # [N, Cin, OH, OW]
    ref = jnp.einsum('oc,nchw->nohw', conv_weight[:, :, 0, 0], up) + y

    assert out.shape == ref.shape
    assert jnp.allclose(out, ref, atol=1e-4, rtol=1e-4), float(
        jnp.max(jnp.abs(out - ref)))

    print("KERNEL_OK")
</pallas_src>

<mosaic_0001>
module attributes {stable_mosaic.version = 11 : i64} {
  func.func @_skip_upsample_kernel(%arg0: i32, %arg1: i32, %arg2: memref<1x128x16xf32, #tpu.memory_space<vmem>>, %arg3: memref<16x32xf32, #tpu.memory_space<vmem>>, %arg4: memref<128x128xf32, #tpu.memory_space<vmem>>, %arg5: memref<1x128x32xf32, #tpu.memory_space<vmem>>, %arg6: memref<1x128x32xf32, #tpu.memory_space<vmem>>) attributes {dimension_semantics = [#tpu.dimension_semantics<parallel>, #tpu.dimension_semantics<parallel>], iteration_bounds = array<i64: 2, 1>, scalar_prefetch = 0 : i64, scratch_operands = 0 : i64, tpu.core_type = #tpu.core_type<tc>, window_params = [{transform_indices = @transform_0, window_bounds = array<i64: 1, 128, 16>}, {transform_indices = @transform_1, window_bounds = array<i64: 16, 32>}, {pipeline_mode = #tpu.pipeline_mode<synchronous>, transform_indices = @transform_2, window_bounds = array<i64: 128, 128>}, {transform_indices = @transform_3, window_bounds = array<i64: 1, 128, 32>}, {transform_indices = @transform_4, window_bounds = array<i64: 1, 128, 32>}]} {
    %c0 = arith.constant 0 : index
    %c0_0 = arith.constant 0 : index
    %c0_1 = arith.constant 0 : index
    %0 = vector.load %arg2[%c0, %c0_0, %c0_1] : memref<1x128x16xf32, #tpu.memory_space<vmem>>, vector<1x128x16xf32>
    %1 = vector.shape_cast %0 : vector<1x128x16xf32> to vector<128x16xf32>
    %c0_2 = arith.constant 0 : index
    %c0_3 = arith.constant 0 : index
    %2 = vector.load %arg3[%c0_2, %c0_3] : memref<16x32xf32, #tpu.memory_space<vmem>>, vector<16x32xf32>
    %cst = arith.constant dense<0.000000e+00> : vector<128x32xf32>
    %3 = tpu.matmul %1, %2, %cst {dimension_numbers = #tpu.dot_dimension_numbers<[1], [0], [0], [1], [0, 0, 1, 1], [], []>} : vector<128x16xf32>, vector<16x32xf32>, vector<128x32xf32> -> vector<128x32xf32>
    %c0_4 = arith.constant 0 : index
    %c0_5 = arith.constant 0 : index
    %4 = vector.load %arg4[%c0_4, %c0_5] : memref<128x128xf32, #tpu.memory_space<vmem>>, vector<128x128xf32>
    %cst_6 = arith.constant dense<0.000000e+00> : vector<128x32xf32>
    %5 = tpu.matmul %4, %3, %cst_6 {dimension_numbers = #tpu.dot_dimension_numbers<[1], [0], [0], [1], [0, 0, 1, 1], [], []>} : vector<128x128xf32>, vector<128x32xf32>, vector<128x32xf32> -> vector<128x32xf32>
    %c0_7 = arith.constant 0 : index
    %c0_8 = arith.constant 0 : index
    %c0_9 = arith.constant 0 : index
    %6 = vector.load %arg5[%c0_7, %c0_8, %c0_9] : memref<1x128x32xf32, #tpu.memory_space<vmem>>, vector<1x128x32xf32>
    %7 = vector.shape_cast %6 : vector<1x128x32xf32> to vector<128x32xf32>
    %8 = arith.addf %5, %7 : vector<128x32xf32>
    %c0_10 = arith.constant 0 : index
    %c0_11 = arith.constant 0 : index
    %c0_12 = arith.constant 0 : index
    %9 = vector.load %arg6[%c0_10, %c0_11, %c0_12] : memref<1x128x32xf32, #tpu.memory_space<vmem>>, vector<1x128x32xf32>
    %10 = vector.shape_cast %9 : vector<1x128x32xf32> to vector<128x32xf32>
    %11 = vector.shape_cast %8 : vector<128x32xf32> to vector<1x128x32xf32>
    tpu.vector_store %arg6[%c0_10, %c0_11, %c0_12], %11 {strides = array<i32>} : memref<1x128x32xf32, #tpu.memory_space<vmem>>, vector<1x128x32xf32>,
    return
  }
  func.func @transform_0(%arg0: i32, %arg1: i32) -> (i32, i32, i32) {
    %c0_i32 = arith.constant 0 : i32
    %c0_i32_0 = arith.constant 0 : i32
    %c0_i32_1 = arith.constant 0 : i32
    return %arg0, %c0_i32, %c0_i32_0 : i32, i32, i32
  }
  func.func @transform_1(%arg0: i32, %arg1: i32) -> (i32, i32) {
    %c0_i32 = arith.constant 0 : i32
    %c0_i32_0 = arith.constant 0 : i32
    return %c0_i32, %arg1 : i32, i32
  }
  func.func @transform_2(%arg0: i32, %arg1: i32) -> (i32, i32) {
    %c0_i32 = arith.constant 0 : i32
    %c0_i32_0 = arith.constant 0 : i32
    %c0_i32_1 = arith.constant 0 : i32
    return %c0_i32, %c0_i32_0 : i32, i32
  }
  func.func @transform_3(%arg0: i32, %arg1: i32) -> (i32, i32, i32) {
    %c0_i32 = arith.constant 0 : i32
    %c0_i32_0 = arith.constant 0 : i32
    return %arg0, %c0_i32, %arg1 : i32, i32, i32
  }
  func.func @transform_4(%arg0: i32, %arg1: i32) -> (i32, i32, i32) {
    %c0_i32 = arith.constant 0 : i32
    %c0_i32_0 = arith.constant 0 : i32
    return %arg0, %c0_i32, %arg1 : i32, i32, i32
  }
}

</mosaic_0001>

<bundles_post_ra>
// kernel: tpu_custom_call.1
= control target key start
LH: loop header
LB: loop body
LE: loop exit
PB: predicated region body
PF: predicated region fallthrough
CT: control target
= control target key end

     0   :  { %s1075_s15 = smov 0   ;;  %s1077_s16 = smov 0   ;;  %s1256_s0 = inlined_call_operand.vmem [shape: f32[2,128,16], index: 0, kind: input, shape index: {}]   ;;  %s1257_s1 = inlined_call_operand.vmem [shape: f32[16,32], index: 1, kind: input, shape index: {}]   ;;  %s1258_s2 = inlined_call_operand.vmem [shape: f32[128,128], index: 2, kind: input, shape index: {}]   ;;  %s1259_s3 = inlined_call_operand.vmem [shape: f32[2,128,32], index: 3, kind: input, shape index: {}]   ;;  %s1260_s4 = inlined_call_operand.vmem [shape: f32[2,128,32], index: 4, kind: output, shape index: {}]  }
   0x1   :  { %s1079_s17 = smov 0  }
   0x2 LB: > { %s26_s18 = sadd.s32 1, %s1044_s16  ;;  %p788_p0 = scmp.ge.s32.totalorder %s1048_s17, 1  ;;  %s1048_s17 = sphi %s1079_s17, %s14_s17   ;;  %s1044_s16 = sphi %s1077_s16, %s1262_s16   ;;  %s1040_s15 = sphi %s1075_s15, %s1261_s15  }
   0x3   : > { %p28_p1 = scmp.ge.s32.totalorder %s26_s18, 2  ;;  %p200_p2 = scmp.lt.s32.totalorder %s1048_s17, 3 }
   0x5   : > { %s1264_s18 = smov (%p28_p1, %s26_s18), 0  ;;  %p201_p3 = pnand %p788_p0, %p200_p2 }
   0x6   : > { %v282_v0 = vld [vmem:[%s1257_s1] sm:$0xff] (!%p201_p3)  ;;  %v283_v1 = vld [vmem:[%s1257_s1 + $0x8] sm:$0xff] (!%p201_p3)  ;;  %p241_p4 = scmp.lt.s32.totalorder (!%p201_p3), %s1040_s15, 1  ;;  %vm284_vm0 = vcmask (!%p201_p3), 130048   ;;  %v484_v19 = vld [vmem:[%s1258_s2 + $0x30] sm:$0xff] (!%p201_p3)  ;;  %vm655_vm1 = vcmask (!%p201_p3), 261120  }
   0x7   : > { %204 = sbr.rel (%p201_p3) target bundleno = 498 (0x1f2), region = 36  ;;  %v950_v2 = vpack.c.bf16 (!%p201_p3), %v283_v1, %v282_v0  ;;  %935 = vmatprep.mubr.f32.mxu1 (!%p201_p3), %v484_v19  ;;  %v478_v20 = vld [vmem:[%s1258_s2] sm:$0xff] (!%p201_p3)  ;;  %v485_v45 = vld [vmem:[%s1258_s2 + $0x38] sm:$0xff] (!%p201_p3)  ;;  %v479_v46 = vld [vmem:[%s1258_s2 + $0x8] sm:$0xff] (!%p201_p3) }
   0x8   : > { %v486_v47 = vld [vmem:[%s1258_s2 + $0x40] sm:$0xff] (!%p201_p3)  ;;  %v480_v48 = vld [vmem:[%s1258_s2 + $0x10] sm:$0xff] (!%p201_p3)  ;;  %v487_v49 = vld [vmem:[%s1258_s2 + $0x48] sm:$0xff] (!%p201_p3) }
   0x9   : > { %951 = vmatprep.subr.bf16.mxu0 (!%p201_p3), %v950_v2  ;;  %v481_v50 = vld [vmem:[%s1258_s2 + $0x18] sm:$0xff] (!%p201_p3)  ;;  %v488_v51 = vld [vmem:[%s1258_s2 + $0x50] sm:$0xff] (!%p201_p3)  ;;  %v482_v52 = vld [vmem:[%s1258_s2 + $0x20] sm:$0xff] (!%p201_p3) }
   0xa   : > { %953 = vmatpush3.bf16.msra.mxu0 (!%p201_p3), %v950_v2  ;;  %v489_v53 = vld [vmem:[%s1258_s2 + $0x58] sm:$0xff] (!%p201_p3)  ;;  %v483_v54 = vld [vmem:[%s1258_s2 + $0x28] sm:$0xff] (!%p201_p3)  ;;  %v490_v55 = vld [vmem:[%s1258_s2 + $0x60] sm:$0xff] (!%p201_p3) }
   0xb   : > { %v491_v56 = vld [vmem:[%s1258_s2 + $0x68] sm:$0xff] (!%p201_p3)  ;;  %v492_v57 = vld [vmem:[%s1258_s2 + $0x70] sm:$0xff] (!%p201_p3)  ;;  %v493_v58 = vld [vmem:[%s1258_s2 + $0x78] sm:$0xff] (!%p201_p3) }
   0xe   : > { %s1266_s15 = smov (!%p241_p4, %s1040_s15), 1 }
   0xf   : > { %s1099_s23 = sshll.u32 %s1266_s15, 7 }
  0x10   : > { %s1105_s26 = scalar_lea.vmem %s1256_s0, %s1099_s23  ;;  %s1191_s13 = scalar_lea.vmem %s1259_s3, %s1099_s23 }
  0x11   : > { %v266_v3 = vld [vmem:[%s1105_s26] sm:$0xff]  ;;  %v267_v4 = vld [vmem:[%s1105_s26 + $0x8] sm:$0xff]  ;;  %v268_v5 = vld [vmem:[%s1105_s26 + $0x10] sm:$0xff]  ;;  %s1201_s19 = scalar_lea.vmem %s1260_s4, %s1099_s23 }
  0x12   : > { %870 = vmatprep.mubr.msk.f32.mxu0 %vm284_vm0, %v266_v3  ;;  %v269_v6 = vld [vmem:[%s1105_s26 + $0x18] sm:$0xff]  ;;  %v270_v7 = vld [vmem:[%s1105_s26 + $0x20] sm:$0xff]  ;;  %v271_v8 = vld [vmem:[%s1105_s26 + $0x28] sm:$0xff] }
  0x13   : > { %871 = vmatmul.mubr.msk.f32.vlgmr.msra.gmra.mrb[0].mxu0 %vm284_vm0, %v267_v4  ;;  %v272_v9 = vld [vmem:[%s1105_s26 + $0x30] sm:$0xff]  ;;  %v273_v10 = vld [vmem:[%s1105_s26 + $0x38] sm:$0xff]  ;;  %v274_v11 = vld [vmem:[%s1105_s26 + $0x40] sm:$0xff] }
  0x14   : > { %873 = vmatprep.mubr.msk.f32.mxu0 %vm284_vm0, %v268_v5  ;;  %v275_v12 = vld [vmem:[%s1105_s26 + $0x48] sm:$0xff]  ;;  %v276_v13 = vld [vmem:[%s1105_s26 + $0x50] sm:$0xff]  ;;  %v277_v14 = vld [vmem:[%s1105_s26 + $0x58] sm:$0xff] }
  0x15   : > { %v278_v15 = vld [vmem:[%s1105_s26 + $0x60] sm:$0xff]  ;;  %v279_v16 = vld [vmem:[%s1105_s26 + $0x68] sm:$0xff]  ;;  %v280_v17 = vld [vmem:[%s1105_s26 + $0x70] sm:$0xff] }
  0x16   : > { %v281_v18 = vld [vmem:[%s1105_s26 + $0x78] sm:$0xff]  ;;  %v495_v60 = vld [vmem:[%s1191_s13 + $0x8] sm:$0xff]  ;;  %v500_v61 = vld [vmem:[%s1191_s13 + $0x30] sm:$0xff] }
  0x17   : > { %874 = vmatmul.mubr.msk.f32.gmra.mrb[2].mxu0 %vm284_vm0, %v269_v6  ;;  %v501_v59 = vld [vmem:[%s1191_s13 + $0x38] sm:$0xff]  ;;  %v494_v62 = vld [vmem:[%s1191_s13] sm:$0xff]  ;;  %v503_v6 = vld [vmem:[%s1191_s13 + $0x48] sm:$0xff] }
  0x18   : > { %876 = vmatprep.mubr.msk.f32.mxu0 %vm284_vm0, %v270_v7 }
  0x1b   : > { %877 = vmatmul.mubr.msk.f32.gmra.mrb[4].mxu0 %vm284_vm0, %v271_v8  ;;  %v497_v8 = vld [vmem:[%s1191_s13 + $0x18] sm:$0xff] }
  0x1c   : > { %879 = vmatprep.mubr.msk.f32.mxu0 %vm284_vm0, %v272_v9  ;;  %v502_v9 = vld [vmem:[%s1191_s13 + $0x40] sm:$0xff] }
  0x1f   : > { %880 = vmatmul.mubr.msk.f32.gmra.mrb[6].mxu0 %vm284_vm0, %v273_v10  ;;  %v496_v10 = vld [vmem:[%s1191_s13 + $0x10] sm:$0xff] }
  0x20   : > { %882 = vmatprep.mubr.msk.f32.mxu0 %vm284_vm0, %v274_v11 }
  0x23   : > { %883 = vmatmul.mubr.msk.f32.gmra.mrb[8].mxu0 %vm284_vm0, %v275_v12 }
  0x24   : > { %885 = vmatprep.mubr.msk.f32.mxu0 %vm284_vm0, %v276_v13 }
  0x27   : > { %886 = vmatmul.mubr.msk.f32.gmra.mrb[10].mxu0 %vm284_vm0, %v277_v14 }
  0x28   : > { %888 = vmatprep.mubr.msk.f32.mxu0 %vm284_vm0, %v278_v15 }
  0x2b   : > { %889 = vmatmul.mubr.msk.f32.gmra.mrb[12].mxu0 %vm284_vm0, %v279_v16 }
  0x2c   : > { %891 = vmatprep.mubr.msk.f32.mxu0 %vm284_vm0, %v280_v17 }
  0x2f   : > { %892 = vmatmul.mubr.msk.f32.gmra.mrb[14].mxu0 %vm284_vm0, %v281_v18  ;;  %v505_v18 = vld [vmem:[%s1191_s13 + $0x58] sm:$0xff] }
  0x30   : > { %926 = vmatprep.mubr.f32.mxu0 %v478_v20  ;;  %v499_v20 = vld [vmem:[%s1191_s13 + $0x28] sm:$0xff] }
  0xe6   : > { %v872_v21 = vpop.f32.mrb[0].mxu0 }
  0xe7   : > { %v399_v22 = vpop.f32.mrb[1].mxu0 }
  0xe8   : > { %v954_v23 = vpack.c.bf16 %v872_v21, %v399_v22  ;;  %v504_v21 = vld [vmem:[%s1191_s13 + $0x50] sm:$0xff]  ;;  %v498_v22 = vld [vmem:[%s1191_s13 + $0x20] sm:$0xff] }
  0xea   : > { %v875_v24 = vpop.f32.mrb[2].mxu0  ;;  %955 = vmatprep.subr.bf16.mxu0 %v954_v23  ;;  %986 = vmatprep.subr.bf16.mxu1 %v954_v23 }
  0xeb   : > { %v409_v25 = vpop.f32.mrb[3].mxu0  ;;  %957 = vmatpush3.bf16.msra.mxu0 %v954_v23  ;;  %994 = vmatpush3.bf16.msra.mxu1 %v954_v23 }
  0xec   : > { %v958_v26 = vpack.c.bf16 %v875_v24, %v409_v25 }
  0xee   : > { %v878_v27 = vpop.f32.mrb[4].mxu0  ;;  %959 = vmatprep.subr.bf16.mxu0 %v958_v26  ;;  %987 = vmatprep.subr.bf16.mxu1 %v958_v26 }
  0xef   : > { %v419_v28 = vpop.f32.mrb[5].mxu0  ;;  %961 = vmatpush3.bf16.msra.mxu0 %v958_v26  ;;  %995 = vmatpush3.bf16.msra.mxu1 %v958_v26 }
  0xf0   : > { %v962_v29 = vpack.c.bf16 %v878_v27, %v419_v28 }
  0xf2   : > { %v881_v30 = vpop.f32.mrb[6].mxu0  ;;  %963 = vmatprep.subr.bf16.mxu0 %v962_v29  ;;  %988 = vmatprep.subr.bf16.mxu1 %v962_v29 }
  0xf3   : > { %v429_v31 = vpop.f32.mrb[7].mxu0  ;;  %965 = vmatpush3.bf16.msra.mxu0 %v962_v29  ;;  %996 = vmatpush3.bf16.msra.mxu1 %v962_v29 }
  0xf4   : > { %v966_v32 = vpack.c.bf16 %v881_v30, %v429_v31  ;;  %v507_v30 = vld [vmem:[%s1191_s13 + $0x68] sm:$0xff] }
  0xf6   : > { %v884_v33 = vpop.f32.mrb[8].mxu0  ;;  %967 = vmatprep.subr.bf16.mxu0 %v966_v32  ;;  %989 = vmatprep.subr.bf16.mxu1 %v966_v32 }
  0xf7   : > { %v439_v34 = vpop.f32.mrb[9].mxu0  ;;  %969 = vmatpush3.bf16.msra.mxu0 %v966_v32  ;;  %997 = vmatpush3.bf16.msra.mxu1 %v966_v32  ;;  %v506_v32 = vld [vmem:[%s1191_s13 + $0x60] sm:$0xff] }
  0xf8   : > { %v970_v35 = vpack.c.bf16 %v884_v33, %v439_v34 }
  0xfa   : > { %v887_v36 = vpop.f32.mrb[10].mxu0  ;;  %971 = vmatprep.subr.bf16.mxu0 %v970_v35  ;;  %990 = vmatprep.subr.bf16.mxu1 %v970_v35 }
  0xfb   : > { %v449_v37 = vpop.f32.mrb[11].mxu0  ;;  %973 = vmatpush3.bf16.msra.mxu0 %v970_v35  ;;  %998 = vmatpush3.bf16.msra.mxu1 %v970_v35 }
  0xfc   : > { %v974_v38 = vpack.c.bf16 %v887_v36, %v449_v37  ;;  %v509_v37 = vld [vmem:[%s1191_s13 + $0x78] sm:$0xff] }
  0xfe   : > { %v890_v39 = vpop.f32.mrb[12].mxu0  ;;  %975 = vmatprep.subr.bf16.mxu0 %v974_v38  ;;  %991 = vmatprep.subr.bf16.mxu1 %v974_v38 }
  0xff   : > { %v459_v40 = vpop.f32.mrb[13].mxu0  ;;  %977 = vmatpush3.bf16.msra.mxu0 %v974_v38  ;;  %999 = vmatpush3.bf16.msra.mxu1 %v974_v38  ;;  %v508_v38 = vld [vmem:[%s1191_s13 + $0x70] sm:$0xff] }
 0x100   : > { %v978_v41 = vpack.c.bf16 %v890_v39, %v459_v40 }
 0x102   : > { %v893_v42 = vpop.f32.mrb[14].mxu0  ;;  %979 = vmatprep.subr.bf16.mxu0 %v978_v41  ;;  %992 = vmatprep.subr.bf16.mxu1 %v978_v41 }
 0x103   : > { %v469_v43 = vpop.f32.mrb[15].mxu0  ;;  %981 = vmatpush3.bf16.msra.mxu0 %v978_v41  ;;  %1000 = vmatpush3.bf16.msra.mxu1 %v978_v41 }
 0x104   : > { %v982_v44 = vpack.c.bf16 %v893_v42, %v469_v43 }
 0x106   : > { %983 = vmatprep.subr.bf16.mxu0 %v982_v44  ;;  %993 = vmatprep.subr.bf16.mxu1 %v982_v44 }
 0x107   : > { %985 = vmatpush3.bf16.msra.mxu0 %v982_v44  ;;  %1001 = vmatpush3.bf16.msra.mxu1 %v982_v44 }
 0x10a   : > { %936 = vmatmul.mubr.f32.vlgmr.msra.gmra.mrb[0].mxu1 %v485_v45  ;;  %927 = vmatmul.mubr.f32.vlgmr.msra.gmra.mrb[16].mxu0 %v479_v46 }
 0x10b   : > { %938 = vmatprep.mubr.f32.mxu1 %v486_v47  ;;  %929 = vmatprep.mubr.f32.mxu0 %v480_v48 }
 0x10e   : > { %939 = vmatmul.mubr.f32.gmra.mrb[2].mxu1 %v487_v49  ;;  %930 = vmatmul.mubr.f32.gmra.mrb[18].mxu0 %v481_v50 }
 0x10f   : > { %941 = vmatprep.mubr.f32.mxu1 %v488_v51  ;;  %932 = vmatprep.mubr.f32.mxu0 %v482_v52 }
 0x112   : > { %942 = vmatmul.mubr.f32.gmra.mrb[4].mxu1 %v489_v53  ;;  %933 = vmatmul.mubr.f32.gmra.mrb[20].mxu0 %v483_v54 }
 0x113   : > { %944 = vmatprep.mubr.f32.mxu1 %v490_v55 }
 0x116   : > { %945 = vmatmul.mubr.f32.gmra.mrb[6].mxu1 %v491_v56 }
 0x117   : > { %947 = vmatprep.mubr.f32.mxu1 %v492_v57 }
 0x11a   : > { %948 = vmatmul.mubr.f32.gmra.mrb[8].mxu1 %v493_v58 }
 0x1dd   : > { %v937_v63 = vpop.f32.mrb[0].mxu1  ;;  %v928_v0 = vpop.f32.mrb[16].mxu0 }
 0x1de   : > { %v612_v1 = vadd.f32 %v937_v63, %v501_v59  ;;  %v606_v2 = vpop.f32.mrb[1].mxu1  ;;  %v582_v3 = vadd.f32 %v928_v0, %v495_v60  ;;  %v576_v4 = vpop.f32.mrb[17].mxu0 }
 0x1df   : > { %v607_v5 = vadd.f32 %v606_v2, %v500_v61  ;;  %v577_v7 = vadd.f32 %v576_v4, %v494_v62 }
 0x1e0   : > { %663 = vst.msk [vmem:[%s1201_s19 + $0x38] sm:$0xff] %vm655_vm1, %v612_v1  ;;  %657 = vst.msk [vmem:[%s1201_s19 + $0x8] sm:$0xff] %vm655_vm1, %v582_v3 }
 0x1e1   : > { %662 = vst.msk [vmem:[%s1201_s19 + $0x30] sm:$0xff] %vm655_vm1, %v607_v5  ;;  %v940_v11 = vpop.f32.mrb[2].mxu1  ;;  %656 = vst.msk [vmem:[%s1201_s19] sm:$0xff] %vm655_vm1, %v577_v7  ;;  %v931_v12 = vpop.f32.mrb[18].mxu0 }
 0x1e2   : > { %v622_v13 = vadd.f32 %v940_v11, %v503_v6  ;;  %v616_v14 = vpop.f32.mrb[3].mxu1  ;;  %v592_v15 = vadd.f32 %v931_v12, %v497_v8  ;;  %v586_v16 = vpop.f32.mrb[19].mxu0 }
 0x1e3   : > { %v617_v17 = vadd.f32 %v616_v14, %v502_v9  ;;  %v587_v19 = vadd.f32 %v586_v16, %v496_v10 }
 0x1e4   : > { %665 = vst.msk [vmem:[%s1201_s19 + $0x48] sm:$0xff] %vm655_vm1, %v622_v13  ;;  %659 = vst.msk [vmem:[%s1201_s19 + $0x18] sm:$0xff] %vm655_vm1, %v592_v15 }
 0x1e5   : > { %664 = vst.msk [vmem:[%s1201_s19 + $0x40] sm:$0xff] %vm655_vm1, %v617_v17  ;;  %v943_v23 = vpop.f32.mrb[4].mxu1  ;;  %658 = vst.msk [vmem:[%s1201_s19 + $0x10] sm:$0xff] %vm655_vm1, %v587_v19  ;;  %v934_v24 = vpop.f32.mrb[20].mxu0 }
 0x1e6   : > { %v632_v25 = vadd.f32 %v943_v23, %v505_v18  ;;  %v626_v26 = vpop.f32.mrb[5].mxu1  ;;  %v602_v27 = vadd.f32 %v934_v24, %v499_v20  ;;  %v596_v28 = vpop.f32.mrb[21].mxu0 }
 0x1e7   : > { %v627_v29 = vadd.f32 %v626_v26, %v504_v21  ;;  %v597_v31 = vadd.f32 %v596_v28, %v498_v22 }
 0x1e8   : > { %667 = vst.msk [vmem:[%s1201_s19 + $0x58] sm:$0xff] %vm655_vm1, %v632_v25  ;;  %661 = vst.msk [vmem:[%s1201_s19 + $0x28] sm:$0xff] %vm655_vm1, %v602_v27 }
 0x1e9   : > { %666 = vst.msk [vmem:[%s1201_s19 + $0x50] sm:$0xff] %vm655_vm1, %v627_v29  ;;  %v946_v33 = vpop.f32.mrb[6].mxu1  ;;  %660 = vst.msk [vmem:[%s1201_s19 + $0x20] sm:$0xff] %vm655_vm1, %v597_v31 }
 0x1ea   : > { %v642_v34 = vadd.f32 %v946_v33, %v507_v30  ;;  %v636_v35 = vpop.f32.mrb[7].mxu1 }
 0x1eb   : > { %v637_v36 = vadd.f32 %v636_v35, %v506_v32 }
 0x1ec   : > { %669 = vst.msk [vmem:[%s1201_s19 + $0x68] sm:$0xff] %vm655_vm1, %v642_v34 }
 0x1ed   : > { %668 = vst.msk [vmem:[%s1201_s19 + $0x60] sm:$0xff] %vm655_vm1, %v637_v36  ;;  %v949_v39 = vpop.f32.mrb[8].mxu1 }
 0x1ee   : > { %v652_v40 = vadd.f32 %v949_v39, %v509_v37  ;;  %v646_v41 = vpop.f32.mrb[9].mxu1 }
 0x1ef   : > { %v647_v42 = vadd.f32 %v646_v41, %v508_v38 }
 0x1f0   : > { %671 = vst.msk [vmem:[%s1201_s19 + $0x78] sm:$0xff] %vm655_vm1, %v652_v40 }
 0x1f1   : > { %670 = vst.msk [vmem:[%s1201_s19 + $0x70] sm:$0xff] %vm655_vm1, %v647_v42 }
 0x1f2 PF: > { %s14_s17 = sadd.s32 1, %s1048_s17   ;;  %s1261_s15 = smov %s1044_s16 }
 0x1f3   : > { %p11_p5 = scmp.ge.s32.totalorder %s14_s17, 4   ;;  %s1262_s16 = smov %s1264_s18 }
 0x1f5   :  { %13 = sbr.rel (!%p11_p5) target bundleno = 2 (0x2), region = 72 }

</bundles_post_ra>
